<compile_context>
chip_gen: v6e
topology: v6e:2x2x1
jax: 0.10.0
libtpu: 0.0.40
codegen_flags: <defaults>
</compile_context>

<pallas_src>
import jax
import jax.numpy as jnp
from jax.experimental import pallas as pl
from jax.experimental.pallas import tpu as pltpu


def _copy_kernel(x_ref, o_ref):
    # The entire "compute" of EmptyLayer: pass the tile through unchanged.
    o_ref[...] = x_ref[...]


_LANE_CANDIDATES = (1024, 512, 256, 128)
# Per-block footprint cap. With double buffering on both input and output
# (2 bufs x (in + out) x tile) this stays <= 16 MiB, safe for v5e's default
# scoped VMEM and well under v7x's 64 MiB physical VMEM.
_MAX_TILE_BYTES = 2 * 1024 * 1024


def _pick_lane_width(total):
    for cand in _LANE_CANDIDATES:
        if total % cand == 0:
            return cand
    return None


def _pick_tile_rows(rows, lane_width, itemsize):
    max_rows = max(8, _MAX_TILE_BYTES // (lane_width * itemsize))
    for cand in (1024, 512, 256, 128, 64, 32, 16, 8):
        if cand <= rows and cand <= max_rows and rows % cand == 0:
            return cand
    # Small / odd row counts: one full-extent block (exempt from (8,128) rule).
    return rows


def empty_layer_forward(x):
    """Identity forward pass (EmptyLayer) as a lane-dense, pipelined Pallas copy.

    # TODO(synk): the truly optimal implementation is to return `x` with no
    # kernel at all (route/shortcut handled at graph level); this kernel only
    # exists to satisfy the Pallas requirement and runs at the HBM copy roofline.
    """
    orig_shape = x.shape
    orig_dtype = x.dtype
    total = x.size

    lane_width = _pick_lane_width(total)
    if lane_width is None:
        # Element count not a multiple of 128: single full-extent block
        # (full array dims are exempt from the (8,128) divisibility rule).
        x2d = x.reshape(1, total)
        rows, cols = x2d.shape
        tile_rows = rows
    else:
        x2d = x.reshape(total // lane_width, lane_width)
        rows, cols = x2d.shape
        tile_rows = _pick_tile_rows(rows, cols, jnp.dtype(orig_dtype).itemsize)

    grid = (rows // tile_rows,)

    out2d = pl.pallas_call(
        _copy_kernel,
        out_shape=jax.ShapeDtypeStruct((rows, cols), orig_dtype),
        grid=grid,
        in_specs=[pl.BlockSpec((tile_rows, cols), lambda i: (i, 0))],
        out_specs=pl.BlockSpec((tile_rows, cols), lambda i: (i, 0)),
        input_output_aliases={0: 0},
        compiler_params=pltpu.CompilerParams(
            dimension_semantics=("parallel",),
        ),
    )(x2d)

    return out2d.reshape(orig_shape)


if __name__ == "__main__":
    key = jax.random.PRNGKey(0)
    # NCHW feature map consistent with a conv net: batch=2, channels=4, 16x16
    x = jax.random.normal(key, (2, 4, 16, 16), dtype=jnp.float32)

    y = empty_layer_forward(x)
    y = jax.block_until_ready(y)

    assert y.shape == x.shape
    assert y.dtype == x.dtype
    assert bool(jnp.all(y == x))

    print("KERNEL_OK")
</pallas_src>

<mosaic_0001>
module attributes {stable_mosaic.version = 11 : i64} {
  func.func @_copy_kernel(%arg0: i32, %arg1: memref<2x1024xf32, #tpu.memory_space<vmem>>, %arg2: memref<2x1024xf32, #tpu.memory_space<vmem>>) attributes {dimension_semantics = [#tpu.dimension_semantics<parallel>], iteration_bounds = array<i64: 1>, scalar_prefetch = 0 : i64, scratch_operands = 0 : i64, tpu.core_type = #tpu.core_type<tc>, window_params = [{transform_indices = @transform_0, window_bounds = array<i64: 2, 1024>}, {transform_indices = @transform_1, window_bounds = array<i64: 2, 1024>}]} {
    %c0 = arith.constant 0 : index
    %c0_0 = arith.constant 0 : index
    %0 = vector.load %arg1[%c0, %c0_0] : memref<2x1024xf32, #tpu.memory_space<vmem>>, vector<2x1024xf32>
    %c0_1 = arith.constant 0 : index
    %c0_2 = arith.constant 0 : index
    %1 = vector.load %arg2[%c0_1, %c0_2] : memref<2x1024xf32, #tpu.memory_space<vmem>>, vector<2x1024xf32>
    tpu.vector_store %arg2[%c0_1, %c0_2], %0 {strides = array<i32>} : memref<2x1024xf32, #tpu.memory_space<vmem>>, vector<2x1024xf32>,
    return
  }
  func.func @transform_0(%arg0: i32) -> (i32, i32) {
    %c0_i32 = arith.constant 0 : i32
    %c0_i32_0 = arith.constant 0 : i32
    return %arg0, %c0_i32 : i32, i32
  }
  func.func @transform_1(%arg0: i32) -> (i32, i32) {
    %c0_i32 = arith.constant 0 : i32
    %c0_i32_0 = arith.constant 0 : i32
    return %arg0, %c0_i32 : i32, i32
  }
}

</mosaic_0001>

<bundles_post_ra>
// kernel: tpu_custom_call.1
= control target key start
LH: loop header
LB: loop body
LE: loop exit
PB: predicated region body
PF: predicated region fallthrough
CT: control target
= control target key end

     0   :  { %6 = vsyncpa [#allocation3], 0  ;;  %s104_s0 = inlined_call_operand.hbm [shape: f32[2,1024], index: 0, kind: input, shape index: {}, may-alias: {0,1}]   ;;  %s105_s1 = inlined_call_operand.hbm [shape: f32[2,1024], index: 1, kind: output, shape index: {}, may-alias: {0,1}]  }
   0x1   :  { %7 = vsyncpa [#allocation4], 0  ;;  %s86_s6 = smov [#allocation2]  }
   0x2   :  { %s14_s7 = sshll.u32 %s86_s6, 4  ;;  %s15_s7 = int_to_ptr.vmem [resolvable:$true] %s14_s7 }
   0x3   :  { %s50_s8 = scalar_lea.vmem %s15_s7, 256  ;;  %p55_p1 = scmp.lt.s32.totalorder %s15_s7, %s15_s7 }
   0x4   :  { %p51_p0 = scmp.ne.s32.totalorder %s15_s7, %s50_s8  ;;  %p56_p2 = scmp.lt.s32.totalorder %s50_s8, %s50_s8 }
   0x6   :  { %p57_p3 = por %p56_p2, %p55_p1 }
   0x8   :  { %p58_p4 = pnand %p57_p3, %p51_p0 }
   0xa   :  { %61 = shalt.err (!%p58_p4)
}
   0xb   :  { %17 = dma.hbm_to_vmem [thread:$0]  %s104_s0, 256, %s15_s7, [#allocation3]  }
   0xc   :  { %82 = dma.done.wait [#allocation3], 256  }
   0xd   :  { %83 = vsyncadd [#allocation3], 4294967040  ;;  %s87_s11 = smov [#allocation5]   ;;  %v21_v0 = vld [vmem:[#allocation2] sm:$0xff]  ;;  %v22_v1 = vld [vmem:[#allocation2 + $0x8] sm:$0xff] }
   0xe   :  { %s31_s12 = sshll.u32 %s87_s11, 4  ;;  %23 = vst [vmem:[#allocation5] sm:$0xff] %v21_v0  ;;  %24 = vst [vmem:[#allocation5 + $0x8] sm:$0xff] %v22_v1  ;;  %s32_s12 = int_to_ptr.vmem [resolvable:$true] %s31_s12 }
   0xf   :  { %s62_s13 = scalar_lea.vmem %s32_s12, 256  ;;  %p67_p6 = scmp.lt.s32.totalorder %s32_s12, %s32_s12 }
  0x10   :  { %p63_p5 = scmp.ne.s32.totalorder %s32_s12, %s62_s13  ;;  %p68_p7 = scmp.lt.s32.totalorder %s62_s13, %s62_s13 }
  0x12   :  { %p69_p8 = por %p68_p7, %p67_p6 }
  0x14   :  { %p70_p9 = pnand %p69_p8, %p63_p5 }
  0x16   :  { %73 = shalt.err (!%p70_p9)
}
  0x17   :  { %34 = dma.vmem_to_hbm [thread:$0]  %s32_s12, 256, %s105_s1, [#allocation4]  }
  0x18   :  { %84 = dma.done.wait [#allocation4], 256  }
  0x19   :  { %85 = vsyncadd [#allocation4], 4294967040 }
  0x1a   :  { %38 = vsyncpa [#allocation3], 1 }
  0x1b   :  { %39 = vsyncpa [#allocation4], 1 }

</bundles_post_ra>
